<compile_context>
chip_gen: v7x
topology: tpu7x:2x2x1
jax: 0.10.0
libtpu: 0.0.40
codegen_flags: <defaults>
</compile_context>

<pallas_src>
import functools

import jax
import jax.numpy as jnp
from jax.experimental import pallas as pl
from jax.experimental.pallas import tpu as pltpu

IN_DIM = 64
HIDDEN = 128
NPAD = 128          # lane-dense padded action dimension
NEG_BIG = -1e30     # padded logit columns -> ~0 probability after softmax


def _round_up(x, m):
    return ((x + m - 1) // m) * m


def policy_kernel(x_ref, w1_ref, b1_ref, w2_ref, b2_ref, out_ref):
    # fc1 + relu   (MXU matmul with f32 accumulation; epilogue in f32)
    h = jnp.dot(x_ref[...], w1_ref[...], preferred_element_type=jnp.float32)
    h = jnp.maximum(h + b1_ref[...], 0.0)                      # [TB,128] + [1,128]

    # fc2 (lane-dense: N = 128, padded columns have w=0, b=-1e30)
    logits = jnp.dot(h.astype(w2_ref.dtype), w2_ref[...],
                     preferred_element_type=jnp.float32)
    logits = logits + b2_ref[...]                              # [TB,128] + [1,128]

    # numerically stable softmax over the (padded) action axis
    m = jnp.max(logits, axis=1, keepdims=True)
    e = jnp.exp(logits - m)                                    # padded cols -> exp(-1e30) = 0
    denom = jnp.sum(e, axis=1, keepdims=True)
    out_ref[...] = (e * pl.reciprocal(denom, approx=True)).astype(out_ref.dtype)


@functools.partial(jax.jit, static_argnames=("block_b", "compute_dtype"))
def policy_forward(x, w1, b1, w2, b2, *, block_b=1024, compute_dtype=jnp.float32):
    """x: [B, 64]; returns softmax probabilities [B, A] (A = w2.shape[1])."""
    B, D = x.shape
    A = w2.shape[1]

    # Lane-dense padding of fc2 to 128 output columns.  Padded bias entries are a
    # large negative constant so padded actions get ~0 probability (NOT zero bias).
    w2p = jnp.zeros((HIDDEN, NPAD), w2.dtype).at[:, :A].set(w2)
    b2p = jnp.full((1, NPAD), NEG_BIG, jnp.float32).at[:, :A].set(b2.reshape(1, A))
    b1r = b1.reshape(1, HIDDEN).astype(jnp.float32)

    # Optional narrow compute dtype for the matmuls (bf16 on v6e/v7x).
    x_c = x.astype(compute_dtype)
    w1_c = w1.astype(compute_dtype)
    w2p_c = w2p.astype(compute_dtype)

    # Batch tiling: TB multiple of 8 (f32 sublanes), capped at block_b.
    TB = min(block_b, _round_up(B, 8))
    Bp = _round_up(B, TB)
    if Bp != B:
        x_c = jnp.pad(x_c, ((0, Bp - B), (0, 0)))
    grid = (Bp // TB,)

    out = pl.pallas_call(
        policy_kernel,
        out_shape=jax.ShapeDtypeStruct((Bp, NPAD), jnp.float32),
        grid_spec=pltpu.PrefetchScalarGridSpec(
            num_scalar_prefetch=0,
            grid=grid,
            in_specs=[
                # streamed per batch tile
                pl.BlockSpec((TB, D), lambda i: (i, 0)),
                # weights/biases: constant block index -> resident in VMEM across the grid
                pl.BlockSpec((D, HIDDEN), lambda i: (0, 0)),
                pl.BlockSpec((1, HIDDEN), lambda i: (0, 0)),
                pl.BlockSpec((HIDDEN, NPAD), lambda i: (0, 0)),
                pl.BlockSpec((1, NPAD), lambda i: (0, 0)),
            ],
            out_specs=pl.BlockSpec((TB, NPAD), lambda i: (i, 0)),
        ),
        compiler_params=pltpu.CompilerParams(
            dimension_semantics=("parallel",),   # shard batch tiles across TCs on v7x
        ),
    )(x_c, w1_c, b1r, w2p_c, b2p)

    return out[:B, :A]


def init_params(key, in_dim=IN_DIM, hidden=HIDDEN, action_size=4):
    # Mimic torch.nn.Linear default init: U(-1/sqrt(fan_in), +1/sqrt(fan_in))
    k1, k2, k3, k4 = jax.random.split(key, 4)
    bound1 = 1.0 / jnp.sqrt(in_dim)
    bound2 = 1.0 / jnp.sqrt(hidden)
    w1 = jax.random.uniform(k1, (in_dim, hidden), jnp.float32, -bound1, bound1)
    b1 = jax.random.uniform(k2, (1, hidden), jnp.float32, -bound1, bound1)
    w2 = jax.random.uniform(k3, (hidden, action_size), jnp.float32, -bound2, bound2)
    b2 = jax.random.uniform(k4, (1, action_size), jnp.float32, -bound2, bound2)
    return w1, b1, w2, b2


if __name__ == "__main__":
    key = jax.random.PRNGKey(0)
    k_x, k_p = jax.random.split(key)

    batch = 8
    action_size = 4  # FrozenLake has 4 actions
    x = jax.random.normal(k_x, (batch, IN_DIM), jnp.float32)
    w1, b1, w2, b2 = init_params(k_p, action_size=action_size)

    # f32 compute for the exactness check; pass compute_dtype=jnp.bfloat16 on v6e/v7x
    # for 2x MXU throughput at large batch.
    probs = policy_forward(x, w1, b1, w2, b2, compute_dtype=jnp.float32)
    probs = jax.block_until_ready(probs)

    # Cross-check against a pure-JAX reference.
    h_ref = jnp.maximum(x @ w1 + b1, 0.0)
    logits_ref = h_ref @ w2 + b2
    probs_ref = jax.nn.softmax(logits_ref, axis=1)

    assert probs.shape == (batch, action_size)
    # approx reciprocal (EUP) in the softmax denominator -> slightly looser tolerance
    assert jnp.allclose(probs, probs_ref, atol=5e-3, rtol=5e-3)
    assert jnp.allclose(jnp.sum(probs, axis=1), 1.0, atol=5e-3)

    print("KERNEL_OK")
</pallas_src>

<mosaic_0001>
module attributes {stable_mosaic.version = 11 : i64} {
  func.func @policy_kernel(%arg0: i32, %arg1: memref<8x64xf32, #tpu.memory_space<vmem>>, %arg2: memref<64x128xf32, #tpu.memory_space<vmem>>, %arg3: memref<1x128xf32, #tpu.memory_space<vmem>>, %arg4: memref<128x128xf32, #tpu.memory_space<vmem>>, %arg5: memref<1x128xf32, #tpu.memory_space<vmem>>, %arg6: memref<8x128xf32, #tpu.memory_space<vmem>>) attributes {dimension_semantics = [#tpu.dimension_semantics<parallel>], iteration_bounds = array<i64: 1>, scalar_prefetch = 0 : i64, scratch_operands = 0 : i64, tpu.core_type = #tpu.core_type<tc>, window_params = [{transform_indices = @transform_0, window_bounds = array<i64: 8, 64>}, {pipeline_mode = #tpu.pipeline_mode<synchronous>, transform_indices = @transform_1, window_bounds = array<i64: 64, 128>}, {pipeline_mode = #tpu.pipeline_mode<synchronous>, transform_indices = @transform_2, window_bounds = array<i64: 1, 128>}, {pipeline_mode = #tpu.pipeline_mode<synchronous>, transform_indices = @transform_3, window_bounds = array<i64: 128, 128>}, {pipeline_mode = #tpu.pipeline_mode<synchronous>, transform_indices = @transform_4, window_bounds = array<i64: 1, 128>}, {transform_indices = @transform_5, window_bounds = array<i64: 8, 128>}]} {
    %c0 = arith.constant 0 : index
    %c0_0 = arith.constant 0 : index
    %0 = vector.load %arg1[%c0, %c0_0] : memref<8x64xf32, #tpu.memory_space<vmem>>, vector<8x64xf32>
    %c0_1 = arith.constant 0 : index
    %c0_2 = arith.constant 0 : index
    %1 = vector.load %arg2[%c0_1, %c0_2] : memref<64x128xf32, #tpu.memory_space<vmem>>, vector<64x128xf32>
    %cst = arith.constant dense<0.000000e+00> : vector<8x128xf32>
    %2 = tpu.matmul %0, %1, %cst {dimension_numbers = #tpu.dot_dimension_numbers<[1], [0], [0], [1], [0, 0, 1, 1], [], []>} : vector<8x64xf32>, vector<64x128xf32>, vector<8x128xf32> -> vector<8x128xf32>
    %c0_3 = arith.constant 0 : index
    %c0_4 = arith.constant 0 : index
    %3 = vector.load %arg3[%c0_3, %c0_4] : memref<1x128xf32, #tpu.memory_space<vmem>>, vector<1x128xf32>
    %4 = vector.broadcast %3 : vector<1x128xf32> to vector<8x128xf32>
    %5 = arith.addf %2, %4 : vector<8x128xf32>
    %cst_5 = arith.constant 0.000000e+00 : f32
    %6 = vector.broadcast %cst_5 : f32 to vector<8x128xf32>
    %7 = arith.maximumf %5, %6 : vector<8x128xf32>
    %c0_6 = arith.constant 0 : index
    %c0_7 = arith.constant 0 : index
    %8 = vector.load %arg4[%c0_6, %c0_7] : memref<128x128xf32, #tpu.memory_space<vmem>>, vector<128x128xf32>
    %cst_8 = arith.constant dense<0.000000e+00> : vector<8x128xf32>
    %9 = tpu.matmul %7, %8, %cst_8 {dimension_numbers = #tpu.dot_dimension_numbers<[1], [0], [0], [1], [0, 0, 1, 1], [], []>} : vector<8x128xf32>, vector<128x128xf32>, vector<8x128xf32> -> vector<8x128xf32>
    %c0_9 = arith.constant 0 : index
    %c0_10 = arith.constant 0 : index
    %10 = vector.load %arg5[%c0_9, %c0_10] : memref<1x128xf32, #tpu.memory_space<vmem>>, vector<1x128xf32>
    %11 = vector.broadcast %10 : vector<1x128xf32> to vector<8x128xf32>
    %12 = arith.addf %9, %11 : vector<8x128xf32>
    %cst_11 = arith.constant dense<0xFF800000> : vector<8xf32>
    %13 = vector.multi_reduction <maximumf>, %12, %cst_11 [1] : vector<8x128xf32> to vector<8xf32>
    %14 = vector.shape_cast %13 : vector<8xf32> to vector<8x1xf32>
    %15 = vector.broadcast %14 : vector<8x1xf32> to vector<8x128xf32>
    %16 = arith.subf %12, %15 : vector<8x128xf32>
    %17 = math.exp %16 : vector<8x128xf32>
    %cst_12 = arith.constant dense<0.000000e+00> : vector<8xf32>
    %18 = vector.multi_reduction <add>, %17, %cst_12 [1] : vector<8x128xf32> to vector<8xf32>
    %19 = vector.shape_cast %18 : vector<8xf32> to vector<8x1xf32>
    %20 = tpu.reciprocal %19 {approx = true} : vector<8x1xf32> -> vector<8x1xf32>
    %21 = vector.broadcast %20 : vector<8x1xf32> to vector<8x128xf32>
    %22 = arith.mulf %17, %21 : vector<8x128xf32>
    %c0_13 = arith.constant 0 : index
    %c0_14 = arith.constant 0 : index
    %23 = vector.load %arg6[%c0_13, %c0_14] : memref<8x128xf32, #tpu.memory_space<vmem>>, vector<8x128xf32>
    tpu.vector_store %arg6[%c0_13, %c0_14], %22 {strides = array<i32>} : memref<8x128xf32, #tpu.memory_space<vmem>>, vector<8x128xf32>,
    return
  }
  func.func @transform_0(%arg0: i32) -> (i32, i32) {
    %c0_i32 = arith.constant 0 : i32
    %c0_i32_0 = arith.constant 0 : i32
    return %arg0, %c0_i32 : i32, i32
  }
  func.func @transform_1(%arg0: i32) -> (i32, i32) {
    %c0_i32 = arith.constant 0 : i32
    %c0_i32_0 = arith.constant 0 : i32
    %c0_i32_1 = arith.constant 0 : i32
    return %c0_i32, %c0_i32_0 : i32, i32
  }
  func.func @transform_2(%arg0: i32) -> (i32, i32) {
    %c0_i32 = arith.constant 0 : i32
    %c0_i32_0 = arith.constant 0 : i32
    %c0_i32_1 = arith.constant 0 : i32
    return %c0_i32, %c0_i32_0 : i32, i32
  }
  func.func @transform_3(%arg0: i32) -> (i32, i32) {
    %c0_i32 = arith.constant 0 : i32
    %c0_i32_0 = arith.constant 0 : i32
    %c0_i32_1 = arith.constant 0 : i32
    return %c0_i32, %c0_i32_0 : i32, i32
  }
  func.func @transform_4(%arg0: i32) -> (i32, i32) {
    %c0_i32 = arith.constant 0 : i32
    %c0_i32_0 = arith.constant 0 : i32
    %c0_i32_1 = arith.constant 0 : i32
    return %c0_i32, %c0_i32_0 : i32, i32
  }
  func.func @transform_5(%arg0: i32) -> (i32, i32) {
    %c0_i32 = arith.constant 0 : i32
    %c0_i32_0 = arith.constant 0 : i32
    return %arg0, %c0_i32 : i32, i32
  }
}

</mosaic_0001>

<bundles_post_ra>
// kernel: policy_forward.1
= control target key start
LH: loop header
LB: loop body
LE: loop exit
PB: predicated region body
PF: predicated region fallthrough
CT: control target
= control target key end

     0   :  { %v344_v0 = vmov 0.0|0.0   ;;  %vm345_vm0 = vmmov 0   ;;  %v346_v4 = vmov 0.0   ;;  %vm36_vm1 = vcmask 523264   ;;  %s473_s1 = inlined_call_operand.vmem [shape: f32[64,128], index: 1, kind: input, shape index: {}]   ;;  %s474_s3 = inlined_call_operand.vmem [shape: f32[128,128], index: 3, kind: input, shape index: {}]   ;;  %s475_s0 = inlined_call_operand.vmem [shape: f32[8,64], index: 0, kind: input, shape index: {}]   ;;  %s476_s2 = inlined_call_operand.vmem [shape: f32[1,128], index: 2, kind: input, shape index: {}]   ;;  %s477_s4 = inlined_call_operand.vmem [shape: f32[1,128], index: 4, kind: input, shape index: {}]   ;;  %s478_s5 = inlined_call_operand.vmem [shape: f32[8,128], index: 5, kind: output, shape index: {}]  }
   0x1   :  { %301 = vmatprep.subr.bf16.mxu0 %v344_v0  ;;  %v21_v1 = vld [vmem:[%s473_s1] sm:$0xff]  ;;  %v22_v2 = vld [vmem:[%s473_s1 + $0x8] sm:$0xff]  ;;  %v23_v3 = vld [vmem:[%s473_s1 + $0x10] sm:$0xff]  ;;  %263 = vmatprep.mubr.msk.f32.mxu0 %vm345_vm0, %v346_v4 }
   0x2   :  { %v302_v5 = vpack.c.bf16 %v22_v2, %v21_v1  ;;  %v24_v6 = vld [vmem:[%s473_s1 + $0x18] sm:$0xff]  ;;  %313 = vmatprep.subr.bf16.mxu1 %v344_v0  ;;  %298 = vmatprep.mubr.msk.f32.mxu1 %vm345_vm0, %v346_v4  ;;  %v111_v8 = vld [vmem:[%s474_s3] sm:$0xff]  ;;  %v112_v9 = vld [vmem:[%s474_s3 + $0x8] sm:$0xff] }
   0x3   :  { %v305_v7 = vpack.c.bf16 %v24_v6, %v23_v3  ;;  %v113_v10 = vld [vmem:[%s474_s3 + $0x10] sm:$0xff]  ;;  %v25_v11 = vld [vmem:[%s473_s1 + $0x20] sm:$0xff]  ;;  %v26_v12 = vld [vmem:[%s473_s1 + $0x28] sm:$0xff]  ;;  %v314_v13 = vpack.c.bf16 %v112_v9, %v111_v8 }
   0x4   :  { %303 = vmatpush3.bf16.msra.mxu0 %v302_v5  ;;  %v114_v14 = vld [vmem:[%s474_s3 + $0x18] sm:$0xff]  ;;  %v308_v16 = vpack.c.bf16 %v26_v12, %v25_v11  ;;  %v115_v17 = vld [vmem:[%s474_s3 + $0x20] sm:$0xff]  ;;  %v116_v18 = vld [vmem:[%s474_s3 + $0x28] sm:$0xff] }
   0x5   :  { %304 = vmatprep.subr.bf16.mxu0 %v344_v0  ;;  %315 = vmatpush3.bf16.msra.mxu1 %v314_v13  ;;  %v317_v15 = vpack.c.bf16 %v114_v14, %v113_v10  ;;  %v27_v19 = vld [vmem:[%s473_s1 + $0x30] sm:$0xff]  ;;  %v28_v20 = vld [vmem:[%s473_s1 + $0x38] sm:$0xff]  ;;  %v320_v21 = vpack.c.bf16 %v116_v18, %v115_v17  ;;  %v20_v26 = vld [vmem:[%s475_s0] sm:$0xff] }
   0x6   :  { %316 = vmatprep.subr.bf16.mxu1 %v344_v0  ;;  %v311_v22 = vpack.c.bf16 %v28_v20, %v27_v19  ;;  %v117_v23 = vld [vmem:[%s474_s3 + $0x30] sm:$0xff]  ;;  %v118_v24 = vld [vmem:[%s474_s3 + $0x38] sm:$0xff]  ;;  %v119_v27 = vld [vmem:[%s474_s3 + $0x40] sm:$0xff] }
   0x7   :  { %v323_v25 = vpack.c.bf16 %v118_v24, %v117_v23  ;;  %v120_v28 = vld [vmem:[%s474_s3 + $0x48] sm:$0xff]  ;;  %v121_v30 = vld [vmem:[%s474_s3 + $0x50] sm:$0xff]  ;;  %v122_v31 = vld [vmem:[%s474_s3 + $0x58] sm:$0xff] }
   0x8   :  { %306 = vmatpush3.bf16.msra.mxu0 %v305_v7  ;;  %v326_v29 = vpack.c.bf16 %v120_v28, %v119_v27  ;;  %v329_v32 = vpack.c.bf16 %v122_v31, %v121_v30  ;;  %v123_v33 = vld [vmem:[%s474_s3 + $0x60] sm:$0xff]  ;;  %v124_v34 = vld [vmem:[%s474_s3 + $0x68] sm:$0xff]  ;;  %v125_v36 = vld [vmem:[%s474_s3 + $0x70] sm:$0xff] }
   0x9   :  { %307 = vmatprep.subr.bf16.mxu0 %v344_v0  ;;  %318 = vmatpush3.bf16.msra.mxu1 %v317_v15  ;;  %v332_v35 = vpack.c.bf16 %v124_v34, %v123_v33  ;;  %v126_v37 = vld [vmem:[%s474_s3 + $0x78] sm:$0xff]  ;;  %v218_v39 = vld [vmem:[%s476_s2] ss:$0 sm:$0xff] }
   0xa   :  { %319 = vmatprep.subr.bf16.mxu1 %v344_v0  ;;  %v335_v38 = vpack.c.bf16 %v126_v37, %v125_v36  ;;  %v220_v44 = vld [vmem:[%s477_s4] ss:$0 sm:$0xff] }
   0xc   :  { %309 = vmatpush3.bf16.msra.mxu0 %v308_v16 }
   0xd   :  { %310 = vmatprep.subr.bf16.mxu0 %v344_v0  ;;  %321 = vmatpush3.bf16.msra.mxu1 %v320_v21 }
   0xe   :  { %322 = vmatprep.subr.bf16.mxu1 %v344_v0 }
  0x10   :  { %312 = vmatpush3.bf16.msra.mxu0 %v311_v22 }
  0x11   :  { %324 = vmatpush3.bf16.msra.mxu1 %v323_v25 }
  0x12   :  { %325 = vmatprep.subr.bf16.mxu1 %v344_v0 }
  0x13   :  { %264 = vmatmul.mubr.msk.f32.vlgmr.msra.gmra.mrb[0].mxu0 %vm36_vm1, %v20_v26 }
  0x15   :  { %327 = vmatpush3.bf16.msra.mxu1 %v326_v29 }
  0x16   :  { %328 = vmatprep.subr.bf16.mxu1 %v344_v0 }
  0x19   :  { %330 = vmatpush3.bf16.msra.mxu1 %v329_v32 }
  0x1a   :  { %331 = vmatprep.subr.bf16.mxu1 %v344_v0 }
  0x1d   :  { %333 = vmatpush3.bf16.msra.mxu1 %v332_v35 }
  0x1e   :  { %334 = vmatprep.subr.bf16.mxu1 %v344_v0 }
  0x21   :  { %336 = vmatpush3.bf16.msra.mxu1 %v335_v38 }
  0xe6   :  { %v106_v40 = vpop.f32.mrb[0].mxu0 }
  0xe7   :  { %v107_v41 = vadd.f32 %v218_v39, %v106_v40  ;;  %v265_v42 = vpop.f32.mrb[1].mxu0 }
  0xe9   :  { %v110_v43 = vmax.f32 %v107_v41, 0.0 }
  0xeb   :  { %299 = vmatmul.mubr.f32.vlgmr.msra.gmra.mrb[0].mxu1 %v110_v43 }
 0x1be   :  { %v200_v45 = vpop.f32.mrb[0].mxu1 }
 0x1bf   :  { %v201_v46 = vadd.f32 %v220_v44, %v200_v45  ;;  %v300_v47 = vpop.f32.mrb[1].mxu1 }
 0x1c1   :  { %204 = vmax.xlane.f32.xlu0 %v201_v46 }
 0x24e   :  { %v205_v48 = vpop.xlane.xlu0 %204 }
 0x24f   :  { %v206_v49 = vsub.f32 %v201_v46, %v205_v48 }
 0x251   :  { %v207_v50 = vmul.f32 1.442695, %v206_v49 }
 0x253   :  { %340 = vpow2.f32 %v207_v50 }
 0x25d   :  { %v341_v51 = vpop.eup %340 }
 0x25e   :  { %209 = vadd.xlane.f32.xlu0 %v341_v51 }
 0x2eb   :  { %v210_v52 = vpop.xlane.xlu0 %209 }
 0x2ec   :  { %342 = vrcp.f32 %v210_v52 }
 0x2f6   :  { %v343_v53 = vpop.eup %342 }
 0x2f7   :  { %v212_v54 = vmul.f32 %v343_v53, %v341_v51 }
 0x2f9   :  { %213 = vst [vmem:[%s478_s5] sm:$0xff] %v212_v54 }

</bundles_post_ra>
